<compile_context>
chip_gen: v7x
topology: tpu7x:2x2x1
jax: 0.10.0
libtpu: 0.0.40
codegen_flags: <defaults>
</compile_context>

<pallas_src>
import functools

import jax
import jax.numpy as jnp
from jax.experimental import pallas as pl
from jax.experimental.pallas import tpu as pltpu

EPS = 1e-5  # nn.BatchNorm2d default eps

# Scoped VMEM budget: < 64 MiB physical on v7x, lots of headroom on v5e/v6e.
_VMEM_LIMIT_BYTES = 48 * 1024 * 1024

# Fused single-pass path: whole x slab resident in VMEM (x + out ~= 2x this).
_FUSED_MAX_X_BYTES = 12 * 1024 * 1024

# Two-pass tile caps (elements).
_ROW_TILE_CAP = 256          # sublane-axis cap (multiple of 8)
_LANE_TILE_CAP_NORM = 4096   # pass 2: 256*4096*4B = 4 MiB blocks (2*(4+4)=16 MiB dbuf)
_LANE_TILE_CAP_STATS = 8192  # pass 1: input-only, so ~2x larger blocks are free


def _round_up(x, m):
    return ((x + m - 1) // m) * m


def _pick_tile(extent, align, cap):
    """Largest multiple of `align` that is <= cap and evenly divides `extent`.
    `extent` is expected to already be a multiple of `align`."""
    t = min(extent, max(cap - cap % align, align))
    t -= t % align
    while t >= align:
        if extent % t == 0:
            return t
        t -= align
    return extent


def _pick_row_tile(nc_pad, align, cap):
    """Row (parallel) tile; prefer >=2 grid steps so v7x can shard both TCs."""
    half = (nc_pad // 2) // align * align
    cap_eff = min(cap, half) if half >= align else cap
    return _pick_tile(nc_pad, align, cap_eff)


# ---------------------------------------------------------------------------
# Fused single-pass kernel: stats + finalize + normalize, x resident in VMEM
# ---------------------------------------------------------------------------
def _fused_kernel(x_ref, gamma_ref, beta_ref, cs_ref, cb_ref, o_ref, *, inv_cnt):
    x = x_ref[...].astype(jnp.float32)                     # (N, C, HW)
    s_row = jnp.sum(x, axis=2, keepdims=True)              # (N, C, 1)
    sq_row = jnp.sum(x * x, axis=2, keepdims=True)         # (N, C, 1)
    s = jnp.sum(s_row, axis=0, keepdims=True)              # (1, C, 1)
    sq = jnp.sum(sq_row, axis=0, keepdims=True)            # (1, C, 1)
    mean = s * inv_cnt
    var = jnp.maximum(sq * inv_cnt - mean * mean, 0.0)     # clamp cancellation
    inv_std = jax.lax.rsqrt(var + EPS)
    bn_scale = inv_std * gamma_ref[...]                    # (1, C, 1)
    bn_bias = beta_ref[...] - mean * bn_scale              # (1, C, 1)
    scale_eff = bn_scale * cs_ref[...]                     # (N, C, 1)
    bias_eff = bn_bias * cs_ref[...] + cb_ref[...]         # (N, C, 1)
    o_ref[...] = (x * scale_eff + bias_eff).astype(o_ref.dtype)


# ---------------------------------------------------------------------------
# Pass 1: per-row (= per (n, c)) sum / sum-of-squares, accumulated over HW tiles
# ---------------------------------------------------------------------------
def _stats_kernel(x_ref, sum_ref, sq_ref):
    # grid = (row_tiles, hw_tiles); hw axis (last) is the reduction axis.
    @pl.when(pl.program_id(1) == 0)
    def _init():
        sum_ref[...] = jnp.zeros_like(sum_ref)
        sq_ref[...] = jnp.zeros_like(sq_ref)

    x = x_ref[...].astype(jnp.float32)                     # (row_tile, hw_tile)
    sum_ref[...] += jnp.sum(x, axis=1, keepdims=True)      # (row_tile, 1)
    sq_ref[...] += jnp.sum(x * x, axis=1, keepdims=True)   # (row_tile, 1)


# ---------------------------------------------------------------------------
# Pass 2: fused normalize + conditional modulation: one mul + one add / element
# ---------------------------------------------------------------------------
def _normalize_kernel(x_ref, scale_ref, bias_ref, o_ref):
    x = x_ref[...].astype(jnp.float32)
    o_ref[...] = (x * scale_ref[...] + bias_ref[...]).astype(o_ref.dtype)


def conditional_batch_norm(x_nchw, latent, w_t, gamma, beta, *, force_two_pass=False):
    """x_nchw: (N, C, H, W); latent: (N, L) or None; w_t: (L, 2C);
    gamma/beta: (1, C) BatchNorm2d affine parameters."""
    N, C, H, W = x_nchw.shape
    HW = H * W
    NC = N * C
    cnt = float(N * HW)
    dtype = x_nchw.dtype
    itemsize = jnp.dtype(dtype).itemsize
    sub_align = 8 if itemsize >= 4 else (16 if itemsize == 2 else 32)

    # ---- Tiny conditional scale/bias (O(N*C), plain JAX matmul) -------------
    if latent is not None:
        sb = jnp.dot(latent.astype(jnp.float32), w_t.astype(jnp.float32))  # (N, 2C)
        cond_scale = sb[:, :C]
        cond_bias = sb[:, C:]
    else:
        cond_scale = jnp.ones((N, C), jnp.float32)
        cond_bias = jnp.zeros((N, C), jnp.float32)

    # ================= Fused single-pass fast path ===========================
    if (NC * HW * itemsize <= _FUSED_MAX_X_BYTES) and not force_two_pass:
        x3 = x_nchw.reshape(N, C, HW)
        gamma3 = gamma.reshape(1, C, 1).astype(jnp.float32)
        beta3 = beta.reshape(1, C, 1).astype(jnp.float32)
        cs3 = cond_scale.reshape(N, C, 1)
        cb3 = cond_bias.reshape(N, C, 1)
        out3 = pl.pallas_call(
            functools.partial(_fused_kernel, inv_cnt=1.0 / cnt),
            out_shape=jax.ShapeDtypeStruct((N, C, HW), dtype),
            compiler_params=pltpu.CompilerParams(
                vmem_limit_bytes=_VMEM_LIMIT_BYTES),
        )(x3, gamma3, beta3, cs3, cb3)
        return out3.reshape(N, C, H, W)

    # ================= Two-pass path ==========================================
    x2 = x_nchw.reshape(NC, HW)

    # Pad to (sub_align, 128)-aligned extents (zero pad leaves sum/sumsq intact).
    # TODO(synk): a cdiv-grid + lane-mask variant would avoid the extra HBM pass
    # that this pad costs for unaligned spatial sizes.
    NC_pad = _round_up(NC, sub_align)
    HW_pad = _round_up(HW, 128)
    hw_tile_norm = _pick_tile(HW_pad, 128, _LANE_TILE_CAP_NORM)
    if HW_pad > _LANE_TILE_CAP_NORM and hw_tile_norm < 1024:
        # Awkward divisors on a big slab: pad a bit more so tiles stay large.
        HW_pad = _round_up(HW, _LANE_TILE_CAP_NORM)
        hw_tile_norm = _LANE_TILE_CAP_NORM
    hw_tile_stats = _pick_tile(HW_pad, 128, _LANE_TILE_CAP_STATS)
    row_tile = _pick_row_tile(NC_pad, sub_align, _ROW_TILE_CAP)

    if NC_pad != NC or HW_pad != HW:
        x2 = jnp.pad(x2, ((0, NC_pad - NC), (0, HW_pad - HW)))

    # ---- Pass 1: tiled per-row sum / sumsq accumulation ---------------------
    row_sum, row_sq = pl.pallas_call(
        _stats_kernel,
        out_shape=(jax.ShapeDtypeStruct((NC_pad, 1), jnp.float32),
                   jax.ShapeDtypeStruct((NC_pad, 1), jnp.float32)),
        grid=(NC_pad // row_tile, HW_pad // hw_tile_stats),
        in_specs=[pl.BlockSpec((row_tile, hw_tile_stats), lambda i, j: (i, j))],
        out_specs=(pl.BlockSpec((row_tile, 1), lambda i, j: (i, 0)),
                   pl.BlockSpec((row_tile, 1), lambda i, j: (i, 0))),
        compiler_params=pltpu.CompilerParams(
            dimension_semantics=("parallel", "arbitrary"),
            vmem_limit_bytes=_VMEM_LIMIT_BYTES),
    )(x2)

    # ---- Tiny O(N*C) finalization in plain JAX ------------------------------
    per_nc_sum = row_sum[:NC, 0].reshape(N, C)
    per_nc_sq = row_sq[:NC, 0].reshape(N, C)
    mean = jnp.sum(per_nc_sum, axis=0) / cnt               # (C,)
    ex2 = jnp.sum(per_nc_sq, axis=0) / cnt                 # (C,)
    var = jnp.maximum(ex2 - mean * mean, 0.0)              # biased, clamped
    inv_std = jax.lax.rsqrt(var + EPS)                     # (C,)

    bn_scale = inv_std * gamma.reshape(C).astype(jnp.float32)   # (C,)
    bn_bias = beta.reshape(C).astype(jnp.float32) - mean * bn_scale

    scale_eff = bn_scale[None, :] * cond_scale             # (N, C)
    bias_eff = bn_bias[None, :] * cond_scale + cond_bias   # (N, C)

    scale_eff = scale_eff.reshape(NC, 1).astype(jnp.float32)
    bias_eff = bias_eff.reshape(NC, 1).astype(jnp.float32)
    if NC_pad != NC:
        scale_eff = jnp.pad(scale_eff, ((0, NC_pad - NC), (0, 0)))
        bias_eff = jnp.pad(bias_eff, ((0, NC_pad - NC), (0, 0)))

    # ---- Pass 2: fully parallel fused elementwise pass ----------------------
    out2 = pl.pallas_call(
        _normalize_kernel,
        out_shape=jax.ShapeDtypeStruct((NC_pad, HW_pad), dtype),
        grid=(NC_pad // row_tile, HW_pad // hw_tile_norm),
        in_specs=[
            pl.BlockSpec((row_tile, hw_tile_norm), lambda i, j: (i, j)),
            pl.BlockSpec((row_tile, 1), lambda i, j: (i, 0)),
            pl.BlockSpec((row_tile, 1), lambda i, j: (i, 0)),
        ],
        out_specs=pl.BlockSpec((row_tile, hw_tile_norm), lambda i, j: (i, j)),
        compiler_params=pltpu.CompilerParams(
            dimension_semantics=("parallel", "parallel"),
            vmem_limit_bytes=_VMEM_LIMIT_BYTES),
    )(x2, scale_eff, bias_eff)

    if NC_pad != NC or HW_pad != HW:
        out2 = out2[:NC, :HW]
    return out2.reshape(N, C, H, W)


def reference(x, latent, w_t, gamma, beta):
    """Pure-JAX reference matching PyTorch training-mode semantics."""
    mean = jnp.mean(x, axis=(0, 2, 3), keepdims=True)
    var = jnp.mean((x - mean) ** 2, axis=(0, 2, 3), keepdims=True)
    g = gamma.reshape(1, -1, 1, 1)
    b = beta.reshape(1, -1, 1, 1)
    normalized = (x - mean) / jnp.sqrt(var + EPS) * g + b
    sb = latent @ w_t
    scale, bias = jnp.split(sb, 2, axis=-1)
    return normalized * scale[:, :, None, None] + bias[:, :, None, None]


if __name__ == "__main__":
    # Small shapes consistent with the module: batch=2, channels=4, spatial=16, latent=8
    N, C, H, W, L = 2, 4, 16, 16, 8

    key = jax.random.PRNGKey(0)
    kx, kz, kw, kg, kb = jax.random.split(key, 5)

    x = jax.random.normal(kx, (N, C, H, W), dtype=jnp.float32)
    latent = jax.random.normal(kz, (N, L), dtype=jnp.float32)

    # nn.Linear(L, 2C, bias=False).weight has shape (2C, L); we pass its transpose.
    bound = 1.0 / (L ** 0.5)
    w = jax.random.uniform(kw, (2 * C, L), minval=-bound, maxval=bound,
                           dtype=jnp.float32)
    w_t = w.T                                              # (L, 2C)

    gamma = (1.0 + 0.1 * jax.random.normal(kg, (1, C))).astype(jnp.float32)
    beta = (0.1 * jax.random.normal(kb, (1, C))).astype(jnp.float32)

    ref = reference(x, latent, w_t, gamma, beta)

    # Fused single-pass path (small slab).
    out = jax.block_until_ready(conditional_batch_norm(x, latent, w_t, gamma, beta))
    assert out.shape == (N, C, H, W)
    assert jnp.allclose(out, ref, atol=1e-3, rtol=1e-3), "fused path mismatch"

    # Two-pass path (same shapes, forced).
    out2 = jax.block_until_ready(
        conditional_batch_norm(x, latent, w_t, gamma, beta, force_two_pass=True))
    assert jnp.allclose(out2, ref, atol=1e-3, rtol=1e-3), "two-pass path mismatch"

    # Unaligned spatial size -> exercises lane padding in the two-pass path.
    H2 = W2 = 10
    x_u = jax.random.normal(kx, (N, C, H2, W2), dtype=jnp.float32)
    ref_u = reference(x_u, latent, w_t, gamma, beta)
    out_u = jax.block_until_ready(
        conditional_batch_norm(x_u, latent, w_t, gamma, beta, force_two_pass=True))
    assert jnp.allclose(out_u, ref_u, atol=1e-3, rtol=1e-3), "unaligned mismatch"

    print("KERNEL_OK")
</pallas_src>

<mosaic_0001>
module attributes {stable_mosaic.version = 11 : i64} {
  func.func @_fused_kernel(%arg0: memref<2x4x256xf32, #tpu.memory_space<vmem>>, %arg1: memref<1x4x1xf32, #tpu.memory_space<vmem>>, %arg2: memref<1x4x1xf32, #tpu.memory_space<vmem>>, %arg3: memref<2x4x1xf32, #tpu.memory_space<vmem>>, %arg4: memref<2x4x1xf32, #tpu.memory_space<vmem>>, %arg5: memref<2x4x256xf32, #tpu.memory_space<vmem>>) attributes {dimension_semantics = [], scalar_prefetch = 0 : i64, scratch_operands = 0 : i64, tpu.core_type = #tpu.core_type<tc>} {
    %c0 = arith.constant 0 : index
    %c0_0 = arith.constant 0 : index
    %c0_1 = arith.constant 0 : index
    %0 = vector.load %arg0[%c0, %c0_0, %c0_1] : memref<2x4x256xf32, #tpu.memory_space<vmem>>, vector<2x4x256xf32>
    %cst = arith.constant dense<0.000000e+00> : vector<2x4xf32>
    %1 = vector.multi_reduction <add>, %0, %cst [2] : vector<2x4x256xf32> to vector<2x4xf32>
    %2 = vector.shape_cast %1 : vector<2x4xf32> to vector<2x4x1xf32>
    %3 = arith.mulf %0, %0 : vector<2x4x256xf32>
    %cst_2 = arith.constant dense<0.000000e+00> : vector<2x4xf32>
    %4 = vector.multi_reduction <add>, %3, %cst_2 [2] : vector<2x4x256xf32> to vector<2x4xf32>
    %5 = vector.shape_cast %4 : vector<2x4xf32> to vector<2x4x1xf32>
    %cst_3 = arith.constant dense<0.000000e+00> : vector<4x1xf32>
    %6 = vector.multi_reduction <add>, %2, %cst_3 [0] : vector<2x4x1xf32> to vector<4x1xf32>
    %7 = vector.shape_cast %6 : vector<4x1xf32> to vector<1x4x1xf32>
    %cst_4 = arith.constant dense<0.000000e+00> : vector<4x1xf32>
    %8 = vector.multi_reduction <add>, %5, %cst_4 [0] : vector<2x4x1xf32> to vector<4x1xf32>
    %9 = vector.shape_cast %8 : vector<4x1xf32> to vector<1x4x1xf32>
    %cst_5 = arith.constant 0.001953125 : f32
    %10 = vector.broadcast %cst_5 : f32 to vector<1x4x1xf32>
    %11 = arith.mulf %7, %10 : vector<1x4x1xf32>
    %cst_6 = arith.constant 0.001953125 : f32
    %12 = vector.broadcast %cst_6 : f32 to vector<1x4x1xf32>
    %13 = arith.mulf %9, %12 : vector<1x4x1xf32>
    %14 = arith.mulf %11, %11 : vector<1x4x1xf32>
    %15 = arith.subf %13, %14 : vector<1x4x1xf32>
    %cst_7 = arith.constant 0.000000e+00 : f32
    %16 = vector.broadcast %cst_7 : f32 to vector<1x4x1xf32>
    %17 = arith.maximumf %15, %16 : vector<1x4x1xf32>
    %cst_8 = arith.constant 9.99999974E-6 : f32
    %18 = vector.broadcast %cst_8 : f32 to vector<1x4x1xf32>
    %19 = arith.addf %17, %18 : vector<1x4x1xf32>
    %20 = math.rsqrt %19 : vector<1x4x1xf32>
    %c0_9 = arith.constant 0 : index
    %c0_10 = arith.constant 0 : index
    %c0_11 = arith.constant 0 : index
    %21 = vector.load %arg1[%c0_9, %c0_10, %c0_11] : memref<1x4x1xf32, #tpu.memory_space<vmem>>, vector<1x4x1xf32>
    %22 = arith.mulf %20, %21 : vector<1x4x1xf32>
    %c0_12 = arith.constant 0 : index
    %c0_13 = arith.constant 0 : index
    %c0_14 = arith.constant 0 : index
    %23 = vector.load %arg2[%c0_12, %c0_13, %c0_14] : memref<1x4x1xf32, #tpu.memory_space<vmem>>, vector<1x4x1xf32>
    %24 = arith.mulf %11, %22 : vector<1x4x1xf32>
    %25 = arith.subf %23, %24 : vector<1x4x1xf32>
    %c0_15 = arith.constant 0 : index
    %c0_16 = arith.constant 0 : index
    %c0_17 = arith.constant 0 : index
    %26 = vector.load %arg3[%c0_15, %c0_16, %c0_17] : memref<2x4x1xf32, #tpu.memory_space<vmem>>, vector<2x4x1xf32>
    %27 = vector.broadcast %22 : vector<1x4x1xf32> to vector<2x4x1xf32>
    %28 = arith.mulf %27, %26 : vector<2x4x1xf32>
    %c0_18 = arith.constant 0 : index
    %c0_19 = arith.constant 0 : index
    %c0_20 = arith.constant 0 : index
    %29 = vector.load %arg3[%c0_18, %c0_19, %c0_20] : memref<2x4x1xf32, #tpu.memory_space<vmem>>, vector<2x4x1xf32>
    %30 = vector.broadcast %25 : vector<1x4x1xf32> to vector<2x4x1xf32>
    %31 = arith.mulf %30, %29 : vector<2x4x1xf32>
    %c0_21 = arith.constant 0 : index
    %c0_22 = arith.constant 0 : index
    %c0_23 = arith.constant 0 : index
    %32 = vector.load %arg4[%c0_21, %c0_22, %c0_23] : memref<2x4x1xf32, #tpu.memory_space<vmem>>, vector<2x4x1xf32>
    %33 = arith.addf %31, %32 : vector<2x4x1xf32>
    %34 = vector.broadcast %28 : vector<2x4x1xf32> to vector<2x4x256xf32>
    %35 = arith.mulf %0, %34 : vector<2x4x256xf32>
    %36 = vector.broadcast %33 : vector<2x4x1xf32> to vector<2x4x256xf32>
    %37 = arith.addf %35, %36 : vector<2x4x256xf32>
    %c0_24 = arith.constant 0 : index
    %c0_25 = arith.constant 0 : index
    %c0_26 = arith.constant 0 : index
    %38 = vector.load %arg5[%c0_24, %c0_25, %c0_26] : memref<2x4x256xf32, #tpu.memory_space<vmem>>, vector<2x4x256xf32>
    tpu.vector_store %arg5[%c0_24, %c0_25, %c0_26], %37 {strides = array<i32>} : memref<2x4x256xf32, #tpu.memory_space<vmem>>, vector<2x4x256xf32>,
    return
  }
}

</mosaic_0001>

<bundles_post_ra>
// kernel: tpu_custom_call.1
= control target key start
LH: loop header
LB: loop body
LE: loop exit
PB: predicated region body
PF: predicated region fallthrough
CT: control target
= control target key end

     0   :  { %vm29_vm0 = vcmask 1043456   ;;  %s290_s0 = inlined_call_operand.vmem [shape: f32[2,4,256], index: 0, kind: input, shape index: {}]   ;;  %s291_s1 = inlined_call_operand.vmem [shape: f32[1,4,1], index: 1, kind: input, shape index: {}]   ;;  %s292_s2 = inlined_call_operand.vmem [shape: f32[1,4,1], index: 2, kind: input, shape index: {}]   ;;  %s293_s3 = inlined_call_operand.vmem [shape: f32[2,4,1], index: 3, kind: input, shape index: {}]   ;;  %s294_s4 = inlined_call_operand.vmem [shape: f32[2,4,1], index: 4, kind: input, shape index: {}]   ;;  %s295_s5 = inlined_call_operand.hbm [shape: f32[2,4,256], index: 5, kind: output, shape index: {}]  }
   0x1   :  { %v229_v0 = vld [vmem:[%s290_s0] sm:$0xff]  ;;  %v234_v1 = vld [vmem:[%s290_s0 + $0x8] sm:$0xff] }
   0x2   :  { %10 = vsyncpa [#allocation3], 0  ;;  %v25_v2 = vcombine.high %v229_v0, %v229_v0  ;;  %v30_v3 = vsel %vm29_vm0, %v229_v0, 0.0  ;;  %v40_v4 = vmul.f32 %v229_v0, %v229_v0  ;;  %v26_v5 = vcombine.high %v234_v1, %v234_v1  ;;  %v71_v37 = vld [vmem:[%s291_s1] sm:$0xf] }
   0x3   :  { %v35_v6 = vsel %vm29_vm0, %v234_v1, 0.0  ;;  %v41_v7 = vmul.f32 %v234_v1, %v234_v1  ;;  %v191_v20 = vmov 0   ;;  %v77_v39 = vld [vmem:[%s293_s3 + $0x4] sm:$0xf]  ;;  %v76_v40 = vld [vmem:[%s293_s3] sm:$0xf]  ;;  %v97_v55 = vlaneseq }
   0x4   :  { %v31_v8 = vsel %vm29_vm0, %v25_v2, 0.0  ;;  %v44_v9 = vcombine.high %v40_v4, %v40_v4  ;;  %v48_v10 = vsel %vm29_vm0, %v40_v4, 0.0  ;;  %v36_v11 = vsel %vm29_vm0, %v26_v5, 0.0  ;;  %162 = vset.pattern.permute.xlu1 %v191_v20  ;;  %161 = vset.pattern.permute.xlu0 %v191_v20  ;;  %v73_v42 = vld [vmem:[%s292_s2] sm:$0xf]  ;;  %s193_s2 = smov [#allocation2]  }
   0x5   :  { %v32_v12 = vadd.f32 %v31_v8, %v30_v3  ;;  %v45_v13 = vcombine.high %v41_v7, %v41_v7  ;;  %v53_v15 = vsel %vm29_vm0, %v41_v7, 0.0  ;;  %v37_v17 = vadd.f32 %v36_v11, %v35_v6  ;;  %v82_v47 = vld [vmem:[%s294_s4] sm:$0xf]  ;;  %v83_v51 = vld [vmem:[%s294_s4 + $0x4] sm:$0xf]  ;;  %s145_s4 = sshll.u32 %s193_s2, 4  ;;  %s146_s4 = int_to_ptr.vmem [resolvable:$true] %s145_s4 }
   0x6   :  { %v49_v14 = vsel %vm29_vm0, %v44_v9, 0.0  ;;  %v192_v53 = vmov 839922192   ;;  %v98_v57 = vshrl.u32 %v97_v55, 7  ;;  %s167_s6 = scalar_lea.vmem %s146_s4, 256  ;;  %p172_p1 = scmp.lt.s32.totalorder %s146_s4, %s146_s4 }
   0x7   :  { %33 = vadd.xlane.f32.xlu0 %v32_v12  ;;  %v50_v16 = vadd.f32 %v49_v14, %v48_v10  ;;  %v54_v18 = vsel %vm29_vm0, %v45_v13, 0.0  ;;  %v95_v54 = vunpack.c.l.s4 %v192_v53  ;;  %p168_p0 = scmp.ne.s32.totalorder %s146_s4, %s167_s6  ;;  %p173_p2 = scmp.lt.s32.totalorder %s167_s6, %s167_s6 }
   0x8   :  { %v55_v19 = vadd.f32 %v54_v18, %v53_v15 }
   0x9   :  { %51 = vadd.xlane.f32.xlu1 %v50_v16  ;;  %v96_v56 = vunpack.c.0.s8 %v95_v54  ;;  %p174_p3 = por %p173_p2, %p172_p1 }
   0xb   :  { %38 = vadd.xlane.f32.xlu0 %v37_v17  ;;  %v99_v58 = vsub.s32 %v96_v56, %v98_v57  ;;  %p175_p4 = pnand %p174_p3, %p168_p0 }
   0xd   :  { %56 = vadd.xlane.f32.xlu1 %v55_v19 }
  0x94   :  { %v34_v21 = vpop.xlane.xlu0 %33 }
  0x95   :  { %v58_v24 = vsel %vm29_vm0, %v34_v21, 0.0 }
  0x96   :  { %v52_v22 = vpop.xlane.xlu1 %51 }
  0x97   :  { %v61_v28 = vsel %vm29_vm0, %v52_v22, 0.0 }
  0x98   :  { %v39_v23 = vpop.xlane.xlu0 %38 }
  0x99   :  { %v59_v25 = vsel %vm29_vm0, %v39_v23, 0.0 }
  0x9a   :  { %v60_v26 = vadd.f32 %v59_v25, %v58_v24  ;;  %v57_v27 = vpop.xlane.xlu1 %56 }
  0x9b   :  { %v62_v29 = vsel %vm29_vm0, %v57_v27, 0.0 }
  0x9c   :  { %v64_v30 = vmul.f32 0.001953125, %v60_v26  ;;  %v63_v31 = vadd.f32 %v62_v29, %v61_v28 }
  0x9e   :  { %v66_v32 = vmul.f32 %v64_v30, %v64_v30  ;;  %v65_v33 = vmul.f32 0.001953125, %v63_v31 }
  0xa0   :  { %v67_v34 = vsub.f32 %v65_v33, %v66_v32 }
  0xa2   :  { %v68_v35 = vmax.f32 %v67_v34, 0.0 }
  0xa4   :  { %v69_v36 = vadd.f32 1e-05, %v68_v35 }
  0xa6   :  { %165 = vrsqrt.f32 %v69_v36 }
  0xb0   :  { %v166_v38 = vpop.eup %165 }
  0xb1   :  { %v72_v41 = vmul.f32 %v166_v38, %v71_v37 }
  0xb3   :  { %v79_v43 = vmul.f32 %v77_v39, %v72_v41  ;;  %v78_v44 = vmul.f32 %v76_v40, %v72_v41  ;;  %v74_v45 = vmul.f32 %v72_v41, %v64_v30 }
  0xb5   :  { %92 = vperm.xlu1 %162, %v79_v43   ;;  %88 = vperm.xlu0 %161, %v78_v44   ;;  %v75_v46 = vsub.f32 %v73_v42, %v74_v45 }
  0xb7   :  { %v80_v48 = vmul.f32 %v76_v40, %v75_v46  ;;  %v81_v50 = vmul.f32 %v77_v39, %v75_v46 }
  0xb9   :  { %v84_v49 = vadd.f32 %v82_v47, %v80_v48  ;;  %v85_v52 = vadd.f32 %v83_v51, %v81_v50 }
  0xbb   :  { %114 = vperm.xlu1 %162, %v84_v49  }
  0xbf   :  { %118 = vperm.xlu1 %162, %v85_v52  }
 0x134   :  { %v89_v59 = vpop.permute.xlu0 %88  ;;  %v93_v60 = vpop.permute.xlu1 %92 }
 0x135   :  { %v100_v61 = vrot.slane %v89_v59, %v99_v58  ;;  %v107_v63 = vrot.slane %v93_v60, %v99_v58 }
 0x137   :  { %v110_v2 = vmul.f32 %v100_v61, %v229_v0  ;;  %v111_v6 = vmul.f32 %v107_v63, %v234_v1 }
 0x13a   :  { %v115_v62 = vpop.permute.xlu1 %114 }
 0x13b   :  { %v126_v3 = vrot.slane %v115_v62, %v99_v58 }
 0x13d   :  { %v136_v4 = vadd.f32 %v126_v3, %v110_v2 }
 0x13e   :  { %v119_v5 = vpop.permute.xlu1 %118 }
 0x13f   :  { %138 = vst [vmem:[#allocation2] sm:$0xff] %v136_v4  ;;  %v133_v7 = vrot.slane %v119_v5, %v99_v58 }
 0x141   :  { %v137_v8 = vadd.f32 %v133_v7, %v111_v6 }
 0x143   :  { %139 = vst [vmem:[#allocation2 + $0x8] sm:$0xff] %v137_v8 }
 0x144   :  { %178 = shalt.err (!%p175_p4)
}
 0x145   :  { %s179_s9 = scalar_lea.hbm %s295_s5, 256 }
 0x146   :  { %p180_p5 = scmp.ne.s32.totalorder %s295_s5, %s179_s9  ;;  %p183_p6 = scmp.lt.u32.totalorder %s179_s9, %s295_s5 }
 0x148   :  { %p185_p7 = pnand %p183_p6, %p180_p5 }
 0x14a   :  { %188 = shalt.err (!%p185_p7)
}
 0x14b   :  { %s194_s14 = smov 128   ;;  %s195_s15 = smov 8  }
 0x14c   :  { %151 = dma.vmem_to_hbm [thread:$0]  %s146_s4, 256, %s295_s5, [#allocation3], %s194_s14, %s194_s14, %s195_s15  }
 0x14d   :  { %189 = dma.done.wait [#allocation3], 256  }
 0x14e   :  { %190 = vsyncadd [#allocation3], 4294967040 }
 0x14f   :  { %155 = vsyncpa [#allocation3], 1 }

</bundles_post_ra>
